<compile_context>
chip_gen: v7x
topology: tpu7x:2x2x1
jax: 0.10.0
libtpu: 0.0.40
codegen_flags: <defaults>
</compile_context>

<pallas_src>
import math
import functools

import jax
import jax.numpy as jnp
from jax.experimental import pallas as pl
from jax.experimental.pallas import tpu as pltpu

EMBED_DIM = 256
MAX_LEN = 5000
DROPOUT_P = 0.1

_VMEM_WORKING_SET_BUDGET = 36 * 1024 * 1024   # double-buffered x-in + out + pe
_VMEM_LIMIT_BYTES = 48 * 1024 * 1024          # < 64 MiB (v7x phys), safe everywhere


def make_sinusoidal_pe(max_len: int, embed_dim: int) -> jnp.ndarray:
    """Matches the PyTorch __init__ buffer (before unsqueeze/transpose)."""
    position = jnp.arange(max_len, dtype=jnp.float32)[:, None]            # (L, 1)
    div_term = jnp.exp(
        jnp.arange(0, embed_dim, 2, dtype=jnp.float32)
        * (-math.log(10000.0) / embed_dim)
    )                                                                      # (D/2,)
    angles = position * div_term                                           # (L, D/2)
    pe = jnp.zeros((max_len, embed_dim), jnp.float32)
    pe = pe.at[:, 0::2].set(jnp.sin(angles))
    pe = pe.at[:, 1::2].set(jnp.cos(angles))
    return pe                                                              # (L, D)


# ---------------------------------------------------------------------------
# Kernels.  x_ref/o_ref: (TS, B*D);  pe_ref: (TS, D).
# ---------------------------------------------------------------------------

def _broadcast_pe(pe, batch):
    # Cheap lane broadcast of the (TS, D) pe tile to the full (TS, B*D) width.
    return pe if batch == 1 else jnp.concatenate([pe] * batch, axis=1)


def _add_pe_kernel(x_ref, pe_ref, o_ref, *, batch):
    # Eval mode: dropout is identity.  Single full-width add + store.
    o_ref[...] = x_ref[...] + _broadcast_pe(pe_ref[...], batch)


def _add_pe_dropout_hwprng_kernel(x_ref, pe_ref, seed_ref, o_ref, *,
                                  batch, threshold, scale):
    # Mix the grid index into the seed: independent dropout bits per tile.
    pltpu.prng_seed(seed_ref[0], pl.program_id(0))
    y = x_ref[...] + _broadcast_pe(pe_ref[...], batch)
    bits = pltpu.bitcast(pltpu.prng_random_bits(y.shape), jnp.uint32)
    keep = bits >= jnp.uint32(threshold)          # P(keep) = 1 - p (int compare)
    o_ref[...] = jnp.where(keep, y * jnp.asarray(scale, y.dtype),
                           jnp.zeros((), y.dtype))


def _add_pe_dropout_bits_kernel(x_ref, pe_ref, bits_ref, o_ref, *,
                                batch, threshold8, scale):
    # Same dropout semantics with uint8 bits streamed in (non-TPU fallback).
    y = x_ref[...] + _broadcast_pe(pe_ref[...], batch)
    keep = bits_ref[...] >= jnp.uint8(threshold8)
    o_ref[...] = jnp.where(keep, y * jnp.asarray(scale, y.dtype),
                           jnp.zeros((), y.dtype))


# ---------------------------------------------------------------------------
# Wrapper.
# ---------------------------------------------------------------------------

def _seq_tile(S, B, D, itemsize):
    """Rows per sequence tile from the double-buffered VMEM working-set budget."""
    per_row = 2 * (2 * B * D + D) * itemsize      # 2 bufs * (x-in + out + pe)
    ts = max(8, (_VMEM_WORKING_SET_BUDGET // per_row) // 8 * 8)
    return min(ts, -(-S // 8) * 8)                # no point exceeding 8-rounded S


def positional_encoding(x, pe_table, *, seed: int = 0,
                        p: float = DROPOUT_P, train: bool = True,
                        use_hw_prng: bool | None = None):
    """x: (S, B, D). Returns dropout(x + pe[:S]) exactly like the PyTorch module."""
    S, B, D = x.shape
    dtype = x.dtype
    itemsize = jnp.dtype(dtype).itemsize

    # Free reshape to a lane/sublane-dense 2-D slab; pe cast to the model dtype.
    x2 = x.reshape(S, B * D)
    pe2 = pe_table[:S, :].astype(dtype)                       # (S, D)

    ts = _seq_tile(S, B, D, itemsize)
    grid = (pl.cdiv(S, ts),)                  # partial tail tile handled by Pallas

    x_spec = pl.BlockSpec((ts, B * D), lambda i: (i, 0))
    pe_spec = pl.BlockSpec((ts, D), lambda i: (i, 0))
    out_shape = jax.ShapeDtypeStruct((S, B * D), dtype)
    compiler_params = pltpu.CompilerParams(
        dimension_semantics=("parallel",),    # split S tiles across TCs on v7x
        vmem_limit_bytes=_VMEM_LIMIT_BYTES)

    apply_dropout = train and p > 0.0
    if not apply_dropout:
        cost = pl.CostEstimate(flops=int(x2.size), transcendentals=0,
                               bytes_accessed=int(2 * x2.nbytes + pe2.nbytes))
        out = pl.pallas_call(
            functools.partial(_add_pe_kernel, batch=B),
            out_shape=out_shape,
            grid=grid,
            in_specs=[x_spec, pe_spec],
            out_specs=x_spec,
            input_output_aliases={0: 0},      # write back into x's buffer
            compiler_params=compiler_params,
            cost_estimate=cost,
        )(x2, pe2)
        return out.reshape(S, B, D)

    # --- training mode (dropout active) ---
    # TODO(synk): PyTorch's RNG stream cannot be bit-matched; a Bernoulli(1-p)
    # keep mask scaled by 1/(1-p) is reproduced.  Vary `seed` per step/layer.
    scale = 1.0 / (1.0 - p)
    if use_hw_prng is None:
        use_hw_prng = jax.default_backend() == "tpu"

    if use_hw_prng:
        threshold = min(int(round(p * (1 << 32))), (1 << 32) - 1)
        seed_arr = jnp.asarray([seed], dtype=jnp.int32)
        cost = pl.CostEstimate(flops=int(3 * x2.size), transcendentals=0,
                               bytes_accessed=int(2 * x2.nbytes + pe2.nbytes))
        out = pl.pallas_call(
            functools.partial(_add_pe_dropout_hwprng_kernel,
                              batch=B, threshold=threshold, scale=scale),
            out_shape=out_shape,
            grid=grid,
            in_specs=[x_spec, pe_spec,
                      pl.BlockSpec(memory_space=pltpu.MemorySpace.SMEM)],
            out_specs=x_spec,
            input_output_aliases={0: 0},
            compiler_params=compiler_params,
            cost_estimate=cost,
        )(x2, pe2, seed_arr)
    else:
        # pltpu.prng_* has no CPU/interpret lowering -> stream precomputed uint8
        # bits (4x less mask traffic than uint32) through the same pipeline.
        threshold8 = min(int(round(p * 256)), 255)
        bits = jax.random.bits(jax.random.PRNGKey(seed), (S, B * D),
                               dtype=jnp.uint8)
        bits_spec = pl.BlockSpec((ts, B * D), lambda i: (i, 0))
        interpret = jax.default_backend() != "tpu"
        cost = pl.CostEstimate(
            flops=int(3 * x2.size), transcendentals=0,
            bytes_accessed=int(2 * x2.nbytes + pe2.nbytes + bits.nbytes))
        out = pl.pallas_call(
            functools.partial(_add_pe_dropout_bits_kernel,
                              batch=B, threshold8=threshold8, scale=scale),
            out_shape=out_shape,
            grid=grid,
            in_specs=[x_spec, pe_spec, bits_spec],
            out_specs=x_spec,
            input_output_aliases={0: 0},
            compiler_params=None if interpret else compiler_params,
            interpret=interpret,
            cost_estimate=cost,
        )(x2, pe2, bits)

    return out.reshape(S, B, D)


if __name__ == "__main__":
    # Small shapes consistent with the module: seq=8, batch=2, embed_dim=256.
    S, B, D = 8, 2, EMBED_DIM
    key = jax.random.PRNGKey(0)
    x = jax.random.normal(key, (S, B, D), dtype=jnp.float32)

    pe_table = make_sinusoidal_pe(MAX_LEN, EMBED_DIM)
    ref = x + pe_table[:S, :][:, None, :]

    # Eval mode (dropout identity): check against the pure-JAX reference.
    y_eval = jax.block_until_ready(positional_encoding(x, pe_table, train=False))
    assert y_eval.shape == (S, B, D)
    assert jnp.allclose(y_eval, ref, atol=1e-5, rtol=1e-5), "eval-mode mismatch"

    # Non-tile-aligned sequence length: exercises the partial tail block
    # (no host-side padding or output slicing anymore).
    S2 = 12
    x_odd = jax.random.normal(jax.random.PRNGKey(1), (S2, B, D), dtype=jnp.float32)
    ref_odd = x_odd + pe_table[:S2, :][:, None, :]
    y_odd = jax.block_until_ready(positional_encoding(x_odd, pe_table, train=False))
    assert y_odd.shape == (S2, B, D)
    assert jnp.allclose(y_odd, ref_odd, atol=1e-5, rtol=1e-5), "partial-tile mismatch"

    # Training mode (dropout active).  Kept entries must equal (x+pe)/(1-p),
    # dropped entries are exactly zero.
    y_train = jax.block_until_ready(
        positional_encoding(x, pe_table, seed=0, train=True))
    assert y_train.shape == (S, B, D)
    assert bool(jnp.all(jnp.isfinite(y_train)))
    kept = y_train != 0.0
    scaled_ref = ref * (1.0 / (1.0 - DROPOUT_P))
    assert jnp.allclose(jnp.where(kept, y_train, 0.0),
                        jnp.where(kept, scaled_ref, 0.0),
                        atol=1e-4, rtol=1e-4), "train-mode mismatch"

    print("KERNEL_OK")
</pallas_src>

<mosaic_0001>
module attributes {stable_mosaic.version = 11 : i64} {
  func.func @_add_pe_kernel(%arg0: i32, %arg1: memref<8x512xf32, #tpu.memory_space<vmem>>, %arg2: memref<8x256xf32, #tpu.memory_space<vmem>>, %arg3: memref<8x512xf32, #tpu.memory_space<vmem>>) attributes {dimension_semantics = [#tpu.dimension_semantics<parallel>], iteration_bounds = array<i64: 1>, scalar_prefetch = 0 : i64, scratch_operands = 0 : i64, tpu.core_type = #tpu.core_type<tc>, window_params = [{transform_indices = @transform_0, window_bounds = array<i64: 8, 512>}, {transform_indices = @transform_1, window_bounds = array<i64: 8, 256>}, {transform_indices = @transform_2, window_bounds = array<i64: 8, 512>}]} {
    %c0 = arith.constant 0 : index
    %c0_0 = arith.constant 0 : index
    %0 = vector.load %arg1[%c0, %c0_0] : memref<8x512xf32, #tpu.memory_space<vmem>>, vector<8x512xf32>
    %c0_1 = arith.constant 0 : index
    %c0_2 = arith.constant 0 : index
    %1 = vector.load %arg2[%c0_1, %c0_2] : memref<8x256xf32, #tpu.memory_space<vmem>>, vector<8x256xf32>
    %2 = tpu.concatenate %1, %1 in 1 : vector<8x256xf32>, vector<8x256xf32> -> vector<8x512xf32>
    %3 = arith.addf %0, %2 : vector<8x512xf32>
    %c0_3 = arith.constant 0 : index
    %c0_4 = arith.constant 0 : index
    %4 = vector.load %arg3[%c0_3, %c0_4] : memref<8x512xf32, #tpu.memory_space<vmem>>, vector<8x512xf32>
    tpu.vector_store %arg3[%c0_3, %c0_4], %3 {strides = array<i32>} : memref<8x512xf32, #tpu.memory_space<vmem>>, vector<8x512xf32>,
    return
  }
  func.func @transform_0(%arg0: i32) -> (i32, i32) {
    %c0_i32 = arith.constant 0 : i32
    %c0_i32_0 = arith.constant 0 : i32
    return %arg0, %c0_i32 : i32, i32
  }
  func.func @transform_1(%arg0: i32) -> (i32, i32) {
    %c0_i32 = arith.constant 0 : i32
    %c0_i32_0 = arith.constant 0 : i32
    return %arg0, %c0_i32 : i32, i32
  }
  func.func @transform_2(%arg0: i32) -> (i32, i32) {
    %c0_i32 = arith.constant 0 : i32
    %c0_i32_0 = arith.constant 0 : i32
    return %arg0, %c0_i32 : i32, i32
  }
}

</mosaic_0001>

<bundles_post_ra>
// kernel: tpu_custom_call.1
= control target key start
LH: loop header
LB: loop body
LE: loop exit
PB: predicated region body
PF: predicated region fallthrough
CT: control target
= control target key end

     0   :  { %7 = vsyncpa [#allocation3], 0  ;;  %s150_s0 = inlined_call_operand.hbm [shape: f32[8,512], index: 0, kind: input, shape index: {}, may-alias: {0,2}]   ;;  %s151_s1 = inlined_call_operand.vmem [shape: f32[8,256], index: 1, kind: input, shape index: {}]   ;;  %s152_s2 = inlined_call_operand.hbm [shape: f32[8,512], index: 2, kind: output, shape index: {}, may-alias: {0,2}]  }
   0x1   :  { %8 = vsyncpa [#allocation4], 0  ;;  %s103_s9 = smov [#allocation2]   ;;  %s55_s13 = scalar_lea.hbm %s150_s0, 512 }
   0x2   :  { %s15_s10 = sshll.u32 %s103_s9, 4  ;;  %p56_p0 = scmp.ne.s32.totalorder %s150_s0, %s55_s13  ;;  %s16_s10 = int_to_ptr.vmem [resolvable:$true] %s15_s10 }
   0x3   :  { %p59_p1 = scmp.lt.u32.totalorder %s55_s13, %s150_s0 }
   0x5   :  { %p61_p2 = pnand %p59_p1, %p56_p0 }
   0x7   :  { %64 = shalt.err (!%p61_p2)
}
   0x8   :  { %s65_s18 = scalar_lea.vmem %s16_s10, 512  ;;  %p70_p4 = scmp.lt.s32.totalorder %s16_s10, %s16_s10 }
   0x9   :  { %p66_p3 = scmp.ne.s32.totalorder %s16_s10, %s65_s18  ;;  %p71_p5 = scmp.lt.s32.totalorder %s65_s18, %s65_s18 }
   0xb   :  { %p72_p6 = por %p71_p5, %p70_p4 }
   0xd   :  { %p73_p7 = pnand %p72_p6, %p66_p3 }
   0xf   :  { %76 = shalt.err (!%p73_p7)
}
  0x10   :  { %18 = dma.hbm_to_vmem [thread:$0]  %s150_s0, 512, %s16_s10, [#allocation3]  }
  0x11   :  { %99 = dma.done.wait [#allocation3], 512  }
  0x12   :  { %100 = vsyncadd [#allocation3], 4294966784  ;;  %s104_s21 = smov [#allocation5]   ;;  %v24_v0 = vld [vmem:[#allocation2] sm:$0xff]  ;;  %v25_v2 = vld [vmem:[#allocation2 + $0x8] sm:$0xff] }
  0x13   :  { %s44_s22 = sshll.u32 %s104_s21, 4  ;;  %v28_v1 = vld [vmem:[%s151_s1] sm:$0xff]  ;;  %v29_v4 = vld [vmem:[%s151_s1 + $0x8] sm:$0xff]  ;;  %v26_v5 = vld [vmem:[#allocation2 + $0x10] sm:$0xff]  ;;  %s45_s22 = int_to_ptr.vmem [resolvable:$true] %s44_s22 }
  0x14   :  { %v30_v3 = vadd.f32 %v28_v1, %v24_v0  ;;  %v27_v6 = vld [vmem:[#allocation2 + $0x18] sm:$0xff]  ;;  %v31_v7 = vadd.f32 %v29_v4, %v25_v2  ;;  %v32_v8 = vadd.f32 %v28_v1, %v26_v5  ;;  %s77_s0 = scalar_lea.vmem %s45_s22, 512  ;;  %p82_p9 = scmp.lt.s32.totalorder %s45_s22, %s45_s22 }
  0x15   :  { %v33_v9 = vadd.f32 %v29_v4, %v27_v6  ;;  %p78_p8 = scmp.ne.s32.totalorder %s45_s22, %s77_s0  ;;  %p83_p10 = scmp.lt.s32.totalorder %s77_s0, %s77_s0 }
  0x16   :  { %34 = vst [vmem:[#allocation5] sm:$0xff] %v30_v3  ;;  %35 = vst [vmem:[#allocation5 + $0x8] sm:$0xff] %v31_v7 }
  0x17   :  { %36 = vst [vmem:[#allocation5 + $0x10] sm:$0xff] %v32_v8  ;;  %37 = vst [vmem:[#allocation5 + $0x18] sm:$0xff] %v33_v9  ;;  %p84_p11 = por %p83_p10, %p82_p9 }
  0x19   :  { %p85_p12 = pnand %p84_p11, %p78_p8 }
  0x1b   :  { %88 = shalt.err (!%p85_p12)
}
  0x1c   :  { %s89_s1 = scalar_lea.hbm %s152_s2, 512 }
  0x1d   :  { %p90_p13 = scmp.ne.s32.totalorder %s152_s2, %s89_s1  ;;  %p93_p0 = scmp.lt.u32.totalorder %s89_s1, %s152_s2 }
  0x1f   :  { %p95_p1 = pnand %p93_p0, %p90_p13 }
  0x21   :  { %98 = shalt.err (!%p95_p1)
}
  0x22   :  { %47 = dma.vmem_to_hbm [thread:$0]  %s45_s22, 512, %s152_s2, [#allocation4]  }
  0x23   :  { %101 = dma.done.wait [#allocation4], 512  }
  0x24   :  { %102 = vsyncadd [#allocation4], 4294966784 }
  0x25   :  { %51 = vsyncpa [#allocation3], 1 }
  0x26   :  { %52 = vsyncpa [#allocation4], 1 }

</bundles_post_ra>
